<compile_context>
chip_gen: v7x
topology: tpu7x:2x2x1
jax: 0.10.0
libtpu: 0.0.40
codegen_flags: <defaults>
</compile_context>

<pallas_src>
from functools import partial

import jax
import jax.numpy as jnp
from jax.experimental import pallas as pl
from jax.experimental.pallas import tpu as pltpu


def _dqn_lstm_kernel(x_ref, wih_ref, whh_ref, b_ref,
                     fc1w_ref, fc1b_ref, outw_ref, outb_ref,
                     q_ref):
    """Full forward pass for one (padded) batch, single LSTM layer.

    x_ref    : (T*B, D)   time-major flattened input (row t*B + b), bf16
    wih_ref  : (D, 4H)    input->gates weights (weight_ih_l0.T), bf16
    whh_ref  : (H, 4H)    hidden->gates weights (weight_hh_l0.T), bf16
    b_ref    : (1, 4H)    combined bias (b_ih + b_hh), f32
    fc1w_ref : (H, H)     fc1 weight (transposed), bf16;  fc1b_ref: (1, H) f32
    outw_ref : (H, A)     out weight (transposed), bf16;  outb_ref: (1, A) f32
    q_ref    : (B, A)     output Q-values, f32
    """
    B = q_ref.shape[0]                 # padded batch (multiple of 8)
    T = x_ref.shape[0] // B
    H = whh_ref.shape[0]

    # Lane mask selecting the g (cell) gate columns.  PyTorch gate order is
    # (i, f, g, o), so g occupies columns [2H, 3H).
    col = jax.lax.broadcasted_iota(jnp.int32, (1, 4 * H), 1)
    g_lane = (col >= 2 * H) & (col < 3 * H)

    # ---- Hoisted input projection + bias: ONE MXU call, off the serial chain.
    # The g columns are pre-doubled so the in-loop sigmoid sees 2x for that
    # gate (tanh(x) = 2*sigmoid(2x) - 1).  Doubling is exact in f32.
    gx = (jnp.dot(x_ref[...], wih_ref[...], preferred_element_type=jnp.float32)
          + b_ref[...])                                    # (T*B, 4H) f32
    gx = jnp.where(g_lane, gx * 2.0, gx)

    # W_hh loaded once; g columns doubled as well (exact in bf16 too).
    whh = whh_ref[...]                                     # (H, 4H) bf16
    whh = jnp.where(g_lane, whh * 2, whh)

    # ---- Recurrence: fully unrolled static loop; h/c live in registers.
    # h is carried in bf16 (the MXU operand dtype); c stays f32.
    h = jnp.zeros((B, H), whh.dtype)
    c = jnp.zeros((B, H), jnp.float32)
    for t in range(T):
        gates = gx[t * B:(t + 1) * B, :] + jnp.dot(
            h, whh, preferred_element_type=jnp.float32)    # (B, 4H) f32
        # Single full-vreg sigmoid (EUP); the g gate is recovered from the
        # same pass via 2*s - 1 (cheap VPU ops off the saturated slot).
        s = jax.nn.sigmoid(gates)
        i_g = s[:, 0 * H:1 * H]
        f_g = s[:, 1 * H:2 * H]
        g_g = 2.0 * s[:, 2 * H:3 * H] - 1.0
        o_g = s[:, 3 * H:4 * H]
        c = f_g * c + i_g * g_g
        h = (o_g * jnp.tanh(c)).astype(whh.dtype)

    # ---- Head: relu(fc1(h_T)) -> out
    z = jnp.maximum(
        jnp.dot(h, fc1w_ref[...], preferred_element_type=jnp.float32)
        + fc1b_ref[...], 0.0)
    q_ref[...] = (
        jnp.dot(z.astype(outw_ref.dtype), outw_ref[...],
                preferred_element_type=jnp.float32) + outb_ref[...]
    ).astype(q_ref.dtype)


@partial(jax.jit, static_argnames=("compute_dtype",))
def dqn_lstm_forward(x, params, *, compute_dtype=jnp.bfloat16):
    """x: (B, T, D) batch-first (like the PyTorch module). Returns (B, A)."""
    B, T, D = x.shape
    H = params["whh"].shape[0]
    A = params["outw"].shape[1]

    # Pad batch to the f32 sublane count so vreg sublanes / MXU rows are full.
    BP = ((B + 7) // 8) * 8

    x_pad = jnp.zeros((BP, T, D), x.dtype).at[:B].set(x)
    # Time-major + flattened so row t*BP + b is timestep t of sample b.
    x_tm = jnp.transpose(x_pad, (1, 0, 2)).reshape(T * BP, D).astype(compute_dtype)

    wih = params["wih"].astype(compute_dtype)
    whh = params["whh"].astype(compute_dtype)
    fc1w = params["fc1w"].astype(compute_dtype)
    outw = params["outw"].astype(compute_dtype)
    b = params["b"].astype(jnp.float32)
    fc1b = params["fc1b"].astype(jnp.float32)
    outb = params["outb"].astype(jnp.float32)

    vmem = pl.BlockSpec(memory_space=pltpu.MemorySpace.VMEM)
    q_pad = pl.pallas_call(
        _dqn_lstm_kernel,
        out_shape=jax.ShapeDtypeStruct((BP, A), jnp.float32),
        in_specs=[vmem] * 8,
        out_specs=vmem,
    )(x_tm, wih, whh, b, fc1w, fc1b, outw, outb)
    return q_pad[:B]


def init_params(key, input_dim, output_dim, hidden_dim):
    """Deterministic synthetic params matching nn.LSTM / nn.Linear shapes."""
    ks = jax.random.split(key, 8)
    s = 1.0 / jnp.sqrt(hidden_dim)
    u = lambda k, shape: jax.random.uniform(k, shape, jnp.float32, -s, s)
    # Stored transposed relative to PyTorch so matmuls are (B,in)@(in,out).
    wih = u(ks[0], (input_dim, 4 * hidden_dim))     # weight_ih_l0.T
    whh = u(ks[1], (hidden_dim, 4 * hidden_dim))    # weight_hh_l0.T
    b = (u(ks[2], (1, 4 * hidden_dim))
         + u(ks[3], (1, 4 * hidden_dim)))           # b_ih + b_hh
    fc1w = u(ks[4], (hidden_dim, hidden_dim))       # fc1.weight.T
    fc1b = u(ks[5], (1, hidden_dim))
    outw = u(ks[6], (hidden_dim, output_dim))       # out.weight.T
    outb = u(ks[7], (1, output_dim))
    return dict(wih=wih, whh=whh, b=b, fc1w=fc1w, fc1b=fc1b,
                outw=outw, outb=outb)


def reference_forward(x, p, *, compute_dtype=jnp.bfloat16):
    """Pure-JAX reference with the same bf16-operand / f32-accumulate math."""
    B, T, D = x.shape
    H = p["whh"].shape[0]
    cd = compute_dtype
    wih = p["wih"].astype(cd)
    whh = p["whh"].astype(cd)
    fc1w = p["fc1w"].astype(cd)
    outw = p["outw"].astype(cd)
    xb = x.astype(cd)
    h = jnp.zeros((B, H), jnp.float32)
    c = jnp.zeros((B, H), jnp.float32)
    for t in range(T):
        gates = (jnp.dot(xb[:, t, :], wih, preferred_element_type=jnp.float32)
                 + jnp.dot(h.astype(cd), whh, preferred_element_type=jnp.float32)
                 + p["b"])
        i = jax.nn.sigmoid(gates[:, 0 * H:1 * H])
        f = jax.nn.sigmoid(gates[:, 1 * H:2 * H])
        g = jnp.tanh(gates[:, 2 * H:3 * H])
        o = jax.nn.sigmoid(gates[:, 3 * H:4 * H])
        c = f * c + i * g
        h = o * jnp.tanh(c)
    z = jnp.maximum(
        jnp.dot(h.astype(cd), fc1w, preferred_element_type=jnp.float32)
        + p["fc1b"], 0.0)
    return (jnp.dot(z.astype(cd), outw, preferred_element_type=jnp.float32)
            + p["outb"])


if __name__ == "__main__":
    # Small shapes consistent with the module's forward:
    # x: (batch=2, seq=8, input_dim=16), hidden_dim=32, output_dim=4 actions.
    B, T, D, H, A = 2, 8, 16, 32, 4
    key = jax.random.PRNGKey(0)
    kx, kp = jax.random.split(key)
    x = jax.random.normal(kx, (B, T, D), jnp.float32)
    params = init_params(kp, D, A, H)

    q = dqn_lstm_forward(x, params)
    q = jax.block_until_ready(q)

    q_ref = reference_forward(x, params)
    assert q.shape == (B, A)
    # bf16 matmul operands (f32 accumulation) on both sides; the only extra
    # kernel-side approximation is tanh(x)=2*sigmoid(2x)-1 on the g gate.
    assert jnp.allclose(q, q_ref, atol=2e-3, rtol=1e-3), "mismatch vs reference"
    print("KERNEL_OK")
</pallas_src>

<mosaic_0001>
module attributes {stable_mosaic.version = 11 : i64} {
  func.func @_dqn_lstm_kernel(%arg0: memref<64x16xbf16, #tpu.memory_space<vmem>>, %arg1: memref<16x128xbf16, #tpu.memory_space<vmem>>, %arg2: memref<32x128xbf16, #tpu.memory_space<vmem>>, %arg3: memref<1x128xf32, #tpu.memory_space<vmem>>, %arg4: memref<32x32xbf16, #tpu.memory_space<vmem>>, %arg5: memref<1x32xf32, #tpu.memory_space<vmem>>, %arg6: memref<32x4xbf16, #tpu.memory_space<vmem>>, %arg7: memref<1x4xf32, #tpu.memory_space<vmem>>, %arg8: memref<8x4xf32, #tpu.memory_space<vmem>>) attributes {dimension_semantics = [], scalar_prefetch = 0 : i64, scratch_operands = 0 : i64, tpu.core_type = #tpu.core_type<tc>} {
    %0 = tpu.iota {dimensions = array<i32: 1>} : vector<1x128xi32>
    %c64_i32 = arith.constant 64 : i32
    %1 = vector.broadcast %c64_i32 : i32 to vector<1x128xi32>
    %2 = arith.cmpi sge, %0, %1 : vector<1x128xi32>
    %c96_i32 = arith.constant 96 : i32
    %3 = vector.broadcast %c96_i32 : i32 to vector<1x128xi32>
    %4 = arith.cmpi slt, %0, %3 : vector<1x128xi32>
    %5 = arith.andi %2, %4 : vector<1x128xi1>
    %c0 = arith.constant 0 : index
    %c0_0 = arith.constant 0 : index
    %6 = vector.load %arg0[%c0, %c0_0] : memref<64x16xbf16, #tpu.memory_space<vmem>>, vector<64x16xbf16>
    %c0_1 = arith.constant 0 : index
    %c0_2 = arith.constant 0 : index
    %7 = vector.load %arg1[%c0_1, %c0_2] : memref<16x128xbf16, #tpu.memory_space<vmem>>, vector<16x128xbf16>
    %cst = arith.constant dense<0.000000e+00> : vector<64x128xf32>
    %8 = tpu.matmul %6, %7, %cst {dimension_numbers = #tpu.dot_dimension_numbers<[1], [0], [0], [1], [0, 0, 1, 1], [], []>} : vector<64x16xbf16>, vector<16x128xbf16>, vector<64x128xf32> -> vector<64x128xf32>
    %c0_3 = arith.constant 0 : index
    %c0_4 = arith.constant 0 : index
    %9 = vector.load %arg3[%c0_3, %c0_4] : memref<1x128xf32, #tpu.memory_space<vmem>>, vector<1x128xf32>
    %10 = vector.broadcast %9 : vector<1x128xf32> to vector<64x128xf32>
    %11 = arith.addf %8, %10 : vector<64x128xf32>
    %cst_5 = arith.constant 2.000000e+00 : f32
    %12 = vector.broadcast %cst_5 : f32 to vector<64x128xf32>
    %13 = arith.mulf %11, %12 : vector<64x128xf32>
    %14 = vector.shape_cast %5 : vector<1x128xi1> to vector<1x128xi1>
    %15 = vector.broadcast %14 : vector<1x128xi1> to vector<64x128xi1>
    %16 = arith.select %15, %13, %11 : vector<64x128xi1>, vector<64x128xf32>
    %c0_6 = arith.constant 0 : index
    %c0_7 = arith.constant 0 : index
    %17 = vector.load %arg2[%c0_6, %c0_7] : memref<32x128xbf16, #tpu.memory_space<vmem>>, vector<32x128xbf16>
    %cst_8 = arith.constant 2.000000e+00 : bf16
    %18 = vector.broadcast %cst_8 : bf16 to vector<32x128xbf16>
    %19 = arith.mulf %17, %18 : vector<32x128xbf16>
    %20 = vector.shape_cast %5 : vector<1x128xi1> to vector<1x128xi1>
    %21 = vector.broadcast %20 : vector<1x128xi1> to vector<32x128xi1>
    %22 = arith.select %21, %19, %17 : vector<32x128xi1>, vector<32x128xbf16>
    %cst_9 = arith.constant 0.000000e+00 : bf16
    %23 = vector.broadcast %cst_9 : bf16 to vector<8x32xbf16>
    %cst_10 = arith.constant 0.000000e+00 : f32
    %24 = vector.broadcast %cst_10 : f32 to vector<8x32xf32>
    %25 = vector.extract_strided_slice %16 {offsets = [0, 0], sizes = [8, 128], strides = [1, 1]} : vector<64x128xf32> to vector<8x128xf32>
    %cst_11 = arith.constant dense<0.000000e+00> : vector<8x128xf32>
    %26 = tpu.matmul %23, %22, %cst_11 {dimension_numbers = #tpu.dot_dimension_numbers<[1], [0], [0], [1], [0, 0, 1, 1], [], []>} : vector<8x32xbf16>, vector<32x128xbf16>, vector<8x128xf32> -> vector<8x128xf32>
    %27 = arith.addf %25, %26 : vector<8x128xf32>
    %28 = arith.negf %27 : vector<8x128xf32>
    %29 = math.exp %28 : vector<8x128xf32>
    %cst_12 = arith.constant 1.000000e+00 : f32
    %30 = vector.broadcast %cst_12 : f32 to vector<8x128xf32>
    %31 = arith.addf %30, %29 : vector<8x128xf32>
    %32 = arith.divf %30, %31 : vector<8x128xf32>
    %33 = vector.extract_strided_slice %32 {offsets = [0, 0], sizes = [8, 32], strides = [1, 1]} : vector<8x128xf32> to vector<8x32xf32>
    %34 = vector.extract_strided_slice %32 {offsets = [0, 32], sizes = [8, 32], strides = [1, 1]} : vector<8x128xf32> to vector<8x32xf32>
    %35 = vector.extract_strided_slice %32 {offsets = [0, 64], sizes = [8, 32], strides = [1, 1]} : vector<8x128xf32> to vector<8x32xf32>
    %cst_13 = arith.constant 2.000000e+00 : f32
    %36 = vector.broadcast %cst_13 : f32 to vector<8x32xf32>
    %37 = arith.mulf %36, %35 : vector<8x32xf32>
    %cst_14 = arith.constant 1.000000e+00 : f32
    %38 = vector.broadcast %cst_14 : f32 to vector<8x32xf32>
    %39 = arith.subf %37, %38 : vector<8x32xf32>
    %40 = vector.extract_strided_slice %32 {offsets = [0, 96], sizes = [8, 32], strides = [1, 1]} : vector<8x128xf32> to vector<8x32xf32>
    %41 = arith.mulf %34, %24 : vector<8x32xf32>
    %42 = arith.mulf %33, %39 : vector<8x32xf32>
    %43 = arith.addf %41, %42 : vector<8x32xf32>
    %44 = math.tanh %43 : vector<8x32xf32>
    %45 = arith.mulf %40, %44 : vector<8x32xf32>
    %46 = arith.truncf %45 : vector<8x32xf32> to vector<8x32xbf16>
    %47 = vector.extract_strided_slice %16 {offsets = [8, 0], sizes = [8, 128], strides = [1, 1]} : vector<64x128xf32> to vector<8x128xf32>
    %cst_15 = arith.constant dense<0.000000e+00> : vector<8x128xf32>
    %48 = tpu.matmul %46, %22, %cst_15 {dimension_numbers = #tpu.dot_dimension_numbers<[1], [0], [0], [1], [0, 0, 1, 1], [], []>} : vector<8x32xbf16>, vector<32x128xbf16>, vector<8x128xf32> -> vector<8x128xf32>
    %49 = arith.addf %47, %48 : vector<8x128xf32>
    %50 = arith.negf %49 : vector<8x128xf32>
    %51 = math.exp %50 : vector<8x128xf32>
    %cst_16 = arith.constant 1.000000e+00 : f32
    %52 = vector.broadcast %cst_16 : f32 to vector<8x128xf32>
    %53 = arith.addf %52, %51 : vector<8x128xf32>
    %54 = arith.divf %52, %53 : vector<8x128xf32>
    %55 = vector.extract_strided_slice %54 {offsets = [0, 0], sizes = [8, 32], strides = [1, 1]} : vector<8x128xf32> to vector<8x32xf32>
    %56 = vector.extract_strided_slice %54 {offsets = [0, 32], sizes = [8, 32], strides = [1, 1]} : vector<8x128xf32> to vector<8x32xf32>
    %57 = vector.extract_strided_slice %54 {offsets = [0, 64], sizes = [8, 32], strides = [1, 1]} : vector<8x128xf32> to vector<8x32xf32>
    %cst_17 = arith.constant 2.000000e+00 : f32
    %58 = vector.broadcast %cst_17 : f32 to vector<8x32xf32>
    %59 = arith.mulf %58, %57 : vector<8x32xf32>
    %cst_18 = arith.constant 1.000000e+00 : f32
    %60 = vector.broadcast %cst_18 : f32 to vector<8x32xf32>
    %61 = arith.subf %59, %60 : vector<8x32xf32>
    %62 = vector.extract_strided_slice %54 {offsets = [0, 96], sizes = [8, 32], strides = [1, 1]} : vector<8x128xf32> to vector<8x32xf32>
    %63 = arith.mulf %56, %43 : vector<8x32xf32>
    %64 = arith.mulf %55, %61 : vector<8x32xf32>
    %65 = arith.addf %63, %64 : vector<8x32xf32>
    %66 = math.tanh %65 : vector<8x32xf32>
    %67 = arith.mulf %62, %66 : vector<8x32xf32>
    %68 = arith.truncf %67 : vector<8x32xf32> to vector<8x32xbf16>
    %69 = vector.extract_strided_slice %16 {offsets = [16, 0], sizes = [8, 128], strides = [1, 1]} : vector<64x128xf32> to vector<8x128xf32>
    %cst_19 = arith.constant dense<0.000000e+00> : vector<8x128xf32>
    %70 = tpu.matmul %68, %22, %cst_19 {dimension_numbers = #tpu.dot_dimension_numbers<[1], [0], [0], [1], [0, 0, 1, 1], [], []>} : vector<8x32xbf16>, vector<32x128xbf16>, vector<8x128xf32> -> vector<8x128xf32>
    %71 = arith.addf %69, %70 : vector<8x128xf32>
    %72 = arith.negf %71 : vector<8x128xf32>
    %73 = math.exp %72 : vector<8x128xf32>
    %cst_20 = arith.constant 1.000000e+00 : f32
    %74 = vector.broadcast %cst_20 : f32 to vector<8x128xf32>
    %75 = arith.addf %74, %73 : vector<8x128xf32>
    %76 = arith.divf %74, %75 : vector<8x128xf32>
    %77 = vector.extract_strided_slice %76 {offsets = [0, 0], sizes = [8, 32], strides = [1, 1]} : vector<8x128xf32> to vector<8x32xf32>
    %78 = vector.extract_strided_slice %76 {offsets = [0, 32], sizes = [8, 32], strides = [1, 1]} : vector<8x128xf32> to vector<8x32xf32>
    %79 = vector.extract_strided_slice %76 {offsets = [0, 64], sizes = [8, 32], strides = [1, 1]} : vector<8x128xf32> to vector<8x32xf32>
    %cst_21 = arith.constant 2.000000e+00 : f32
    %80 = vector.broadcast %cst_21 : f32 to vector<8x32xf32>
    %81 = arith.mulf %80, %79 : vector<8x32xf32>
    %cst_22 = arith.constant 1.000000e+00 : f32
    %82 = vector.broadcast %cst_22 : f32 to vector<8x32xf32>
    %83 = arith.subf %81, %82 : vector<8x32xf32>
    %84 = vector.extract_strided_slice %76 {offsets = [0, 96], sizes = [8, 32], strides = [1, 1]} : vector<8x128xf32> to vector<8x32xf32>
    %85 = arith.mulf %78, %65 : vector<8x32xf32>
    %86 = arith.mulf %77, %83 : vector<8x32xf32>
    %87 = arith.addf %85, %86 : vector<8x32xf32>
    %88 = math.tanh %87 : vector<8x32xf32>
    %89 = arith.mulf %84, %88 : vector<8x32xf32>
    %90 = arith.truncf %89 : vector<8x32xf32> to vector<8x32xbf16>
    %91 = vector.extract_strided_slice %16 {offsets = [24, 0], sizes = [8, 128], strides = [1, 1]} : vector<64x128xf32> to vector<8x128xf32>
    %cst_23 = arith.constant dense<0.000000e+00> : vector<8x128xf32>
    %92 = tpu.matmul %90, %22, %cst_23 {dimension_numbers = #tpu.dot_dimension_numbers<[1], [0], [0], [1], [0, 0, 1, 1], [], []>} : vector<8x32xbf16>, vector<32x128xbf16>, vector<8x128xf32> -> vector<8x128xf32>
    %93 = arith.addf %91, %92 : vector<8x128xf32>
    %94 = arith.negf %93 : vector<8x128xf32>
    %95 = math.exp %94 : vector<8x128xf32>
    %cst_24 = arith.constant 1.000000e+00 : f32
    %96 = vector.broadcast %cst_24 : f32 to vector<8x128xf32>
    %97 = arith.addf %96, %95 : vector<8x128xf32>
    %98 = arith.divf %96, %97 : vector<8x128xf32>
    %99 = vector.extract_strided_slice %98 {offsets = [0, 0], sizes = [8, 32], strides = [1, 1]} : vector<8x128xf32> to vector<8x32xf32>
    %100 = vector.extract_strided_slice %98 {offsets = [0, 32], sizes = [8, 32], strides = [1, 1]} : vector<8x128xf32> to vector<8x32xf32>
    %101 = vector.extract_strided_slice %98 {offsets = [0, 64], sizes = [8, 32], strides = [1, 1]} : vector<8x128xf32> to vector<8x32xf32>
    %cst_25 = arith.constant 2.000000e+00 : f32
    %102 = vector.broadcast %cst_25 : f32 to vector<8x32xf32>
    %103 = arith.mulf %102, %101 : vector<8x32xf32>
    %cst_26 = arith.constant 1.000000e+00 : f32
    %104 = vector.broadcast %cst_26 : f32 to vector<8x32xf32>
    %105 = arith.subf %103, %104 : vector<8x32xf32>
    %106 = vector.extract_strided_slice %98 {offsets = [0, 96], sizes = [8, 32], strides = [1, 1]} : vector<8x128xf32> to vector<8x32xf32>
    %107 = arith.mulf %100, %87 : vector<8x32xf32>
    %108 = arith.mulf %99, %105 : vector<8x32xf32>
    %109 = arith.addf %107, %108 : vector<8x32xf32>
    %110 = math.tanh %109 : vector<8x32xf32>
    %111 = arith.mulf %106, %110 : vector<8x32xf32>
    %112 = arith.truncf %111 : vector<8x32xf32> to vector<8x32xbf16>
    %113 = vector.extract_strided_slice %16 {offsets = [32, 0], sizes = [8, 128], strides = [1, 1]} : vector<64x128xf32> to vector<8x128xf32>
    %cst_27 = arith.constant dense<0.000000e+00> : vector<8x128xf32>
    %114 = tpu.matmul %112, %22, %cst_27 {dimension_numbers = #tpu.dot_dimension_numbers<[1], [0], [0], [1], [0, 0, 1, 1], [], []>} : vector<8x32xbf16>, vector<32x128xbf16>, vector<8x128xf32> -> vector<8x128xf32>
    %115 = arith.addf %113, %114 : vector<8x128xf32>
    %116 = arith.negf %115 : vector<8x128xf32>
    %117 = math.exp %116 : vector<8x128xf32>
    %cst_28 = arith.constant 1.000000e+00 : f32
    %118 = vector.broadcast %cst_28 : f32 to vector<8x128xf32>
    %119 = arith.addf %118, %117 : vector<8x128xf32>
    %120 = arith.divf %118, %119 : vector<8x128xf32>
    %121 = vector.extract_strided_slice %120 {offsets = [0, 0], sizes = [8, 32], strides = [1, 1]} : vector<8x128xf32> to vector<8x32xf32>
    %122 = vector.extract_strided_slice %120 {offsets = [0, 32], sizes = [8, 32], strides = [1, 1]} : vector<8x128xf32> to vector<8x32xf32>
    %123 = vector.extract_strided_slice %120 {offsets = [0, 64], sizes = [8, 32], strides = [1, 1]} : vector<8x128xf32> to vector<8x32xf32>
    %cst_29 = arith.constant 2.000000e+00 : f32
    %124 = vector.broadcast %cst_29 : f32 to vector<8x32xf32>
    %125 = arith.mulf %124, %123 : vector<8x32xf32>
    %cst_30 = arith.constant 1.000000e+00 : f32
    %126 = vector.broadcast %cst_30 : f32 to vector<8x32xf32>
    %127 = arith.subf %125, %126 : vector<8x32xf32>
    %128 = vector.extract_strided_slice %120 {offsets = [0, 96], sizes = [8, 32], strides = [1, 1]} : vector<8x128xf32> to vector<8x32xf32>
    %129 = arith.mulf %122, %109 : vector<8x32xf32>
    %130 = arith.mulf %121, %127 : vector<8x32xf32>
    %131 = arith.addf %129, %130 : vector<8x32xf32>
    %132 = math.tanh %131 : vector<8x32xf32>
    %133 = arith.mulf %128, %132 : vector<8x32xf32>
    %134 = arith.truncf %133 : vector<8x32xf32> to vector<8x32xbf16>
    %135 = vector.extract_strided_slice %16 {offsets = [40, 0], sizes = [8, 128], strides = [1, 1]} : vector<64x128xf32> to vector<8x128xf32>
    %cst_31 = arith.constant dense<0.000000e+00> : vector<8x128xf32>
    %136 = tpu.matmul %134, %22, %cst_31 {dimension_numbers = #tpu.dot_dimension_numbers<[1], [0], [0], [1], [0, 0, 1, 1], [], []>} : vector<8x32xbf16>, vector<32x128xbf16>, vector<8x128xf32> -> vector<8x128xf32>
    %137 = arith.addf %135, %136 : vector<8x128xf32>
    %138 = arith.negf %137 : vector<8x128xf32>
    %139 = math.exp %138 : vector<8x128xf32>
    %cst_32 = arith.constant 1.000000e+00 : f32
    %140 = vector.broadcast %cst_32 : f32 to vector<8x128xf32>
    %141 = arith.addf %140, %139 : vector<8x128xf32>
    %142 = arith.divf %140, %141 : vector<8x128xf32>
    %143 = vector.extract_strided_slice %142 {offsets = [0, 0], sizes = [8, 32], strides = [1, 1]} : vector<8x128xf32> to vector<8x32xf32>
    %144 = vector.extract_strided_slice %142 {offsets = [0, 32], sizes = [8, 32], strides = [1, 1]} : vector<8x128xf32> to vector<8x32xf32>
    %145 = vector.extract_strided_slice %142 {offsets = [0, 64], sizes = [8, 32], strides = [1, 1]} : vector<8x128xf32> to vector<8x32xf32>
    %cst_33 = arith.constant 2.000000e+00 : f32
    %146 = vector.broadcast %cst_33 : f32 to vector<8x32xf32>
    %147 = arith.mulf %146, %145 : vector<8x32xf32>
    %cst_34 = arith.constant 1.000000e+00 : f32
    %148 = vector.broadcast %cst_34 : f32 to vector<8x32xf32>
    %149 = arith.subf %147, %148 : vector<8x32xf32>
    %150 = vector.extract_strided_slice %142 {offsets = [0, 96], sizes = [8, 32], strides = [1, 1]} : vector<8x128xf32> to vector<8x32xf32>
    %151 = arith.mulf %144, %131 : vector<8x32xf32>
    %152 = arith.mulf %143, %149 : vector<8x32xf32>
    %153 = arith.addf %151, %152 : vector<8x32xf32>
    %154 = math.tanh %153 : vector<8x32xf32>
    %155 = arith.mulf %150, %154 : vector<8x32xf32>
    %156 = arith.truncf %155 : vector<8x32xf32> to vector<8x32xbf16>
    %157 = vector.extract_strided_slice %16 {offsets = [48, 0], sizes = [8, 128], strides = [1, 1]} : vector<64x128xf32> to vector<8x128xf32>
    %cst_35 = arith.constant dense<0.000000e+00> : vector<8x128xf32>
    %158 = tpu.matmul %156, %22, %cst_35 {dimension_numbers = #tpu.dot_dimension_numbers<[1], [0], [0], [1], [0, 0, 1, 1], [], []>} : vector<8x32xbf16>, vector<32x128xbf16>, vector<8x128xf32> -> vector<8x128xf32>
    %159 = arith.addf %157, %158 : vector<8x128xf32>
    %160 = arith.negf %159 : vector<8x128xf32>
    %161 = math.exp %160 : vector<8x128xf32>
    %cst_36 = arith.constant 1.000000e+00 : f32
    %162 = vector.broadcast %cst_36 : f32 to vector<8x128xf32>
    %163 = arith.addf %162, %161 : vector<8x128xf32>
    %164 = arith.divf %162, %163 : vector<8x128xf32>
    %165 = vector.extract_strided_slice %164 {offsets = [0, 0], sizes = [8, 32], strides = [1, 1]} : vector<8x128xf32> to vector<8x32xf32>
    %166 = vector.extract_strided_slice %164 {offsets = [0, 32], sizes = [8, 32], strides = [1, 1]} : vector<8x128xf32> to vector<8x32xf32>
    %167 = vector.extract_strided_slice %164 {offsets = [0, 64], sizes = [8, 32], strides = [1, 1]} : vector<8x128xf32> to vector<8x32xf32>
    %cst_37 = arith.constant 2.000000e+00 : f32
    %168 = vector.broadcast %cst_37 : f32 to vector<8x32xf32>
    %169 = arith.mulf %168, %167 : vector<8x32xf32>
    %cst_38 = arith.constant 1.000000e+00 : f32
    %170 = vector.broadcast %cst_38 : f32 to vector<8x32xf32>
    %171 = arith.subf %169, %170 : vector<8x32xf32>
    %172 = vector.extract_strided_slice %164 {offsets = [0, 96], sizes = [8, 32], strides = [1, 1]} : vector<8x128xf32> to vector<8x32xf32>
    %173 = arith.mulf %166, %153 : vector<8x32xf32>
    %174 = arith.mulf %165, %171 : vector<8x32xf32>
    %175 = arith.addf %173, %174 : vector<8x32xf32>
    %176 = math.tanh %175 : vector<8x32xf32>
    %177 = arith.mulf %172, %176 : vector<8x32xf32>
    %178 = arith.truncf %177 : vector<8x32xf32> to vector<8x32xbf16>
    %179 = vector.extract_strided_slice %16 {offsets = [56, 0], sizes = [8, 128], strides = [1, 1]} : vector<64x128xf32> to vector<8x128xf32>
    %cst_39 = arith.constant dense<0.000000e+00> : vector<8x128xf32>
    %180 = tpu.matmul %178, %22, %cst_39 {dimension_numbers = #tpu.dot_dimension_numbers<[1], [0], [0], [1], [0, 0, 1, 1], [], []>} : vector<8x32xbf16>, vector<32x128xbf16>, vector<8x128xf32> -> vector<8x128xf32>
    %181 = arith.addf %179, %180 : vector<8x128xf32>
    %182 = arith.negf %181 : vector<8x128xf32>
    %183 = math.exp %182 : vector<8x128xf32>
    %cst_40 = arith.constant 1.000000e+00 : f32
    %184 = vector.broadcast %cst_40 : f32 to vector<8x128xf32>
    %185 = arith.addf %184, %183 : vector<8x128xf32>
    %186 = arith.divf %184, %185 : vector<8x128xf32>
    %187 = vector.extract_strided_slice %186 {offsets = [0, 0], sizes = [8, 32], strides = [1, 1]} : vector<8x128xf32> to vector<8x32xf32>
    %188 = vector.extract_strided_slice %186 {offsets = [0, 32], sizes = [8, 32], strides = [1, 1]} : vector<8x128xf32> to vector<8x32xf32>
    %189 = vector.extract_strided_slice %186 {offsets = [0, 64], sizes = [8, 32], strides = [1, 1]} : vector<8x128xf32> to vector<8x32xf32>
    %cst_41 = arith.constant 2.000000e+00 : f32
    %190 = vector.broadcast %cst_41 : f32 to vector<8x32xf32>
    %191 = arith.mulf %190, %189 : vector<8x32xf32>
    %cst_42 = arith.constant 1.000000e+00 : f32
    %192 = vector.broadcast %cst_42 : f32 to vector<8x32xf32>
    %193 = arith.subf %191, %192 : vector<8x32xf32>
    %194 = vector.extract_strided_slice %186 {offsets = [0, 96], sizes = [8, 32], strides = [1, 1]} : vector<8x128xf32> to vector<8x32xf32>
    %195 = arith.mulf %188, %175 : vector<8x32xf32>
    %196 = arith.mulf %187, %193 : vector<8x32xf32>
    %197 = arith.addf %195, %196 : vector<8x32xf32>
    %198 = math.tanh %197 : vector<8x32xf32>
    %199 = arith.mulf %194, %198 : vector<8x32xf32>
    %200 = arith.truncf %199 : vector<8x32xf32> to vector<8x32xbf16>
    %c0_43 = arith.constant 0 : index
    %c0_44 = arith.constant 0 : index
    %201 = vector.load %arg4[%c0_43, %c0_44] : memref<32x32xbf16, #tpu.memory_space<vmem>>, vector<32x32xbf16>
    %cst_45 = arith.constant dense<0.000000e+00> : vector<8x32xf32>
    %202 = tpu.matmul %200, %201, %cst_45 {dimension_numbers = #tpu.dot_dimension_numbers<[1], [0], [0], [1], [0, 0, 1, 1], [], []>} : vector<8x32xbf16>, vector<32x32xbf16>, vector<8x32xf32> -> vector<8x32xf32>
    %c0_46 = arith.constant 0 : index
    %c0_47 = arith.constant 0 : index
    %203 = vector.load %arg5[%c0_46, %c0_47] : memref<1x32xf32, #tpu.memory_space<vmem>>, vector<1x32xf32>
    %204 = vector.broadcast %203 : vector<1x32xf32> to vector<8x32xf32>
    %205 = arith.addf %202, %204 : vector<8x32xf32>
    %cst_48 = arith.constant 0.000000e+00 : f32
    %206 = vector.broadcast %cst_48 : f32 to vector<8x32xf32>
    %207 = arith.maximumf %205, %206 : vector<8x32xf32>
    %208 = arith.truncf %207 : vector<8x32xf32> to vector<8x32xbf16>
    %c0_49 = arith.constant 0 : index
    %c0_50 = arith.constant 0 : index
    %209 = vector.load %arg6[%c0_49, %c0_50] : memref<32x4xbf16, #tpu.memory_space<vmem>>, vector<32x4xbf16>
    %cst_51 = arith.constant dense<0.000000e+00> : vector<8x4xf32>
    %210 = tpu.matmul %208, %209, %cst_51 {dimension_numbers = #tpu.dot_dimension_numbers<[1], [0], [0], [1], [0, 0, 1, 1], [], []>} : vector<8x32xbf16>, vector<32x4xbf16>, vector<8x4xf32> -> vector<8x4xf32>
    %c0_52 = arith.constant 0 : index
    %c0_53 = arith.constant 0 : index
    %211 = vector.load %arg7[%c0_52, %c0_53] : memref<1x4xf32, #tpu.memory_space<vmem>>, vector<1x4xf32>
    %212 = vector.broadcast %211 : vector<1x4xf32> to vector<8x4xf32>
    %213 = arith.addf %210, %212 : vector<8x4xf32>
    %c0_54 = arith.constant 0 : index
    %c0_55 = arith.constant 0 : index
    %214 = vector.load %arg8[%c0_54, %c0_55] : memref<8x4xf32, #tpu.memory_space<vmem>>, vector<8x4xf32>
    tpu.vector_store %arg8[%c0_54, %c0_55], %213 {strides = array<i32>} : memref<8x4xf32, #tpu.memory_space<vmem>>, vector<8x4xf32>,
    return
  }
}

</mosaic_0001>

<bundles_post_ra>
// kernel: dqn_lstm_forward.1
= control target key start
LH: loop header
LB: loop body
LE: loop exit
PB: predicated region body
PF: predicated region fallthrough
CT: control target
= control target key end

     0   :  { %v31_v0 = vlaneseq  ;;  %vm79_vm0 = vcmask 130048   ;;  %v1155_v2 = vmov 0.0   ;;  %vm1156_vm1 = vmmov 0   ;;  %s1159_s19 = smov 32   ;;  %s1412_s1 = inlined_call_operand.vmem [shape: bf16[16,128], index: 1, kind: input, shape index: {}]   ;;  %s1413_s0 = inlined_call_operand.vmem [shape: bf16[64,16], index: 0, kind: input, shape index: {}]   ;;  %s1414_s2 = inlined_call_operand.vmem [shape: bf16[32,128], index: 2, kind: input, shape index: {}]   ;;  %s1415_s3 = inlined_call_operand.vmem [shape: f32[1,128], index: 3, kind: input, shape index: {}]   ;;  %s1416_s4 = inlined_call_operand.vmem [shape: bf16[32,32], index: 4, kind: input, shape index: {}]   ;;  %s1417_s6 = inlined_call_operand.vmem [shape: bf16[32,4], index: 6, kind: input, shape index: {}]   ;;  %s1418_s5 = inlined_call_operand.vmem [shape: f32[1,32], index: 5, kind: input, shape index: {}]   ;;  %s1419_s7 = inlined_call_operand.vmem [shape: f32[1,4], index: 7, kind: input, shape index: {}]   ;;  %s1420_s8 = inlined_call_operand.vmem [shape: f32[8,4], index: 8, kind: output, shape index: {}]  }
   0x1   :  { %v1098_v1 = vld [vmem:[%s1412_s1] sm:$0xff]   ;;  %1013 = vmatprep.subr.bf16.mxu1 %v1155_v2  ;;  %1017 = vmatprep.mubr.msk.bf16.mxu1 %vm1156_vm1, %v1155_v2  ;;  %v1100_v5 = vld [vmem:[%s1413_s0 + $0x8] sm:$0xff]   ;;  %v1157_v21 = vmov 0   ;;  %vm200_vm6 = vcmask 261120   ;;  %vm919_vm7 = vcmask 31744  }
   0x2   :  { %v1099_v3 = vld [vmem:[%s1413_s0] sm:$0xff]   ;;  %v32_v4 = vand.u32 127, %v31_v0  ;;  %1003 = vmatprep.subr.bf16.mxu0 %v1098_v1  ;;  %v177_v11 = vld [vmem:[%s1414_s2 + $0x8] sm:$0xf]  ;;  %v178_v12 = vld [vmem:[%s1414_s2 + $0xc] sm:$0xf] }
   0x3   :  { %1004 = vmatpush3.bf16.msra.mxu0 %v1098_v1  ;;  %1005 = vmatprep.mubr.msk.bf16.mxu0 %vm79_vm0, %v1099_v3  ;;  %v175_v6 = vld [vmem:[%s1414_s2] sm:$0xf]  ;;  %v176_v7 = vld [vmem:[%s1414_s2 + $0x4] sm:$0xf]  ;;  %v181_v13 = vmul.bf16 1073758208, %v177_v11  ;;  %v182_v14 = vmul.bf16 1073758208, %v178_v12 }
   0x4   :  { %vm33_vm2 = vcmp.ge.s32.totalorder %v32_v4, 64  ;;  %vm34_vm3 = vcmp.lt.s32.totalorder %v32_v4, 96  ;;  %v179_v9 = vmul.bf16 1073758208, %v175_v6  ;;  %v180_v10 = vmul.bf16 1073758208, %v176_v7  ;;  %1029 = vmatprep.subr.bf16.mxu0 %v1155_v2  ;;  %v1260_v22 = vld [vmem:[%s1415_s3] ss:$0 sm:$0xff] }
   0x5   :  { %vm1224_vm4 = vmand %vm33_vm2, %vm34_vm3  ;;  %s1158_s3 = smov 64  }
   0x6   :  { %vm183_vm5 = vmpackc.low %vm1224_vm4, %vm1224_vm4  ;;  %1006 = vmatmul.mubr.msk.bf16.vlgmr.msra.gmra.mrb[0].mxu0 %vm79_vm0, %v1100_v5 }
   0x7   :  { %v184_v15 = vsel %vm183_vm5, %v179_v9, %v175_v6  ;;  %v185_v16 = vsel %vm183_vm5, %v180_v10, %v176_v7  ;;  %v186_v18 = vsel %vm183_vm5, %v181_v13, %v177_v11  ;;  %v187_v19 = vsel %vm183_vm5, %v182_v14, %v178_v12  ;;  %v1101_v7 = vld [vmem:[%s1413_s0 + $0x10] sm:$0xff]   ;;  %v1102_v9 = vld [vmem:[%s1413_s0 + $0x18] sm:$0xff]  }
   0x8   :  { %v1239_v17 = vcombine.low %v184_v15, %v185_v16  ;;  %v1242_v20 = vcombine.low %v186_v18, %v187_v19  ;;  %1009 = vmatprep.mubr.msk.bf16.mxu0 %vm79_vm0, %v1101_v7 }
   0xa   :  { %1014 = vmatpush3.bf16.msra.mxu1 %v1239_v17  ;;  %1030 = vmatpush3.bf16.msra.mxu0 %v1239_v17 }
   0xb   :  { %1015 = vmatprep.subr.bf16.mxu1 %v1155_v2  ;;  %1031 = vmatprep.subr.bf16.mxu0 %v1155_v2 }
   0xe   :  { %1016 = vmatpush3.bf16.msra.mxu1 %v1242_v20  ;;  %1032 = vmatpush3.bf16.msra.mxu0 %v1242_v20 }
   0xf   :  { %1021 = vmatprep.subr.bf16.mxu1 %v1155_v2  ;;  %1045 = vmatprep.subr.bf16.mxu0 %v1155_v2 }
  0x10   :  { %1010 = vmatmul.mubr.msk.bf16.gmra.mrb[4].mxu0 %vm79_vm0, %v1102_v9 }
  0x11   :  { %1018 = vmatmul.mubr.bf16.vlgmr.msra.gmra.mrb[0].mxu1 %v1157_v21  ;;  %1033 = vmatprep.mubr.msk.bf16.mxu0 %vm1156_vm1, %v1155_v2 }
  0x12   :  { %1022 = vmatpush3.bf16.msra.mxu1 %v1239_v17  ;;  %1025 = vmatprep.mubr.msk.bf16.mxu1 %vm1156_vm1, %v1155_v2 }
  0x13   :  { %1023 = vmatprep.subr.bf16.mxu1 %v1155_v2 }
  0x16   :  { %1024 = vmatpush3.bf16.msra.mxu1 %v1242_v20 }
  0x17   :  { %1037 = vmatprep.subr.bf16.mxu1 %v1155_v2 }
  0xd9   :  { %v1262_v23 = vpop.f32.mrb[0].mxu0 }
  0xda   :  { %v126_v24 = vpop.f32.mrb[1].mxu0  ;;  %v135_v21 = vadd.f32 %v1262_v23, %v1260_v22 }
  0xdb   :  { %v127_v25 = vadd.f32 %v1260_v22, %v126_v24  ;;  %v1265_v26 = vpop.f32.mrb[2].mxu0 }
  0xdc   :  { %v129_v27 = vpop.f32.mrb[3].mxu0  ;;  %v159_v24 = vmul.f32 2.0, %v135_v21 }
  0xdd   :  { %v157_v28 = vmul.f32 2.0, %v127_v25  ;;  %v130_v51 = vadd.f32 %v1260_v22, %v129_v27 }
  0xdf   :  { %v167_v29 = vsel %vm1224_vm4, %v157_v28, %v127_v25  ;;  %v158_v52 = vmul.f32 2.0, %v130_v51  ;;  %v169_v25 = vsel %vm1224_vm4, %v159_v24, %v135_v21 }
  0xe1   :  { %v168_v53 = vsel %vm1224_vm4, %v158_v52, %v130_v51 }
  0xe3   :  { %v1297_v14 = vpop.f32.mrb[4].mxu0 }
  0xe4   :  { %v238_v30 = vpop.f32.mrb[0].mxu1  ;;  %v1299_v15 = vpop.f32.mrb[5].mxu0 }
  0xe5   :  { %v244_v31 = vadd.f32 %v238_v30, %v167_v29  ;;  %v1019_v32 = vpop.f32.mrb[1].mxu1  ;;  %v1301_v16 = vpop.f32.mrb[6].mxu0  ;;  %v143_v7 = vadd.f32 %v1260_v22, %v1299_v15 }
  0xe6   :  { %v241_v33 = vpop.f32.mrb[2].mxu1  ;;  %v1303_v18 = vpop.f32.mrb[7].mxu0 }
  0xe7   :  { %v937_v34 = vmul.f32 -1.442695, %v244_v31  ;;  %v1020_v35 = vpop.f32.mrb[3].mxu1  ;;  %v161_v9 = vmul.f32 2.0, %v143_v7 }
  0xe9   :  { %1107 = vpow2.f32 %v937_v34 }
  0xf3   :  { %v1108_v36 = vpop.eup %1107 }
  0xf4   :  { %v248_v37 = vadd.f32 1.0, %v1108_v36 }
  0xf6   :  { %1109 = vrcp.f32 %v248_v37 }
 0x100   :  { %v1110_v38 = vpop.eup %1109 }
 0x101   :  { %v251_v39 = vmul.f32 2.0, %v1110_v38  ;;  %v253_v43 = vmul.f32 0.0, %v1110_v38 }
 0x103   :  { %v938_v40 = vadd.f32 -1.0, %v251_v39 }
 0x105   :  { %255 = vrot.lane.b32.xlu0 %v938_v40, %s1158_s3 }
 0x177   :  { %v256_v41 = vpop.permute.xlu0 %255 }
 0x178   :  { %v258_v42 = vmul.f32 %v1110_v38, %v256_v41 }
 0x17a   :  { %260 = vrot.lane.b32.xlu0 %v258_v42, %s1159_s19 }
 0x1ec   :  { %v261_v44 = vpop.permute.xlu0 %260 }
 0x1ed   :  { %v263_v45 = vadd.f32 %v261_v44, %v253_v43 }
 0x1ef   :  { %1111 = vtanh.f32 %v263_v45 }
 0x1f9   :  { %v1112_v46 = vpop.eup %1111 }
 0x1fa   :  { %266 = vrot.lane.b32.xlu1 %v1112_v46, %s1158_s3 }
 0x26c   :  { %v267_v47 = vpop.permute.xlu1 %266 }
 0x26d   :  { %v269_v48 = vmul.f32 %v1110_v38, %v267_v47  ;;  %v138_v47 = vadd.f32 %v1265_v26, %v1260_v22 }
 0x26f   :  { %v270_v49 = vpack.c.bf16 %v269_v48, %v269_v48  ;;  %v160_v48 = vmul.f32 2.0, %v138_v47 }
 0x271   :  { %272 = vrot.lane.b32.xlu1 %v270_v49, %s1159_s19  ;;  %v170_v49 = vsel %vm1224_vm4, %v160_v48, %v138_v47 }
 0x2e3   :  { %v273_v50 = vpop.permute.xlu1 %272 }
 0x2e4   :  { %1026 = vmatmul.mubr.msk.bf16.vlgmr.msra.gmra.mrb[4].mxu1 %vm200_vm6, %v273_v50 }
 0x2e5   :  { %1038 = vmatpush3.bf16.msra.mxu1 %v1239_v17  ;;  %1041 = vmatprep.mubr.msk.bf16.mxu1 %vm1156_vm1, %v1155_v2 }
 0x2e6   :  { %1039 = vmatprep.subr.bf16.mxu1 %v1155_v2 }
 0x2e9   :  { %1040 = vmatpush3.bf16.msra.mxu1 %v1242_v20 }
 0x2ea   :  { %1053 = vmatprep.subr.bf16.mxu1 %v1155_v2 }
 0x3b7   :  { %v311_v54 = vpop.f32.mrb[4].mxu1 }
 0x3b8   :  { %v317_v55 = vadd.f32 %v311_v54, %v168_v53  ;;  %v1027_v56 = vpop.f32.mrb[5].mxu1 }
 0x3b9   :  { %v314_v57 = vpop.f32.mrb[6].mxu1 }
 0x3ba   :  { %v940_v58 = vmul.f32 -1.442695, %v317_v55  ;;  %v1028_v59 = vpop.f32.mrb[7].mxu1 }
 0x3bc   :  { %1113 = vpow2.f32 %v940_v58 }
 0x3c6   :  { %v1114_v60 = vpop.eup %1113 }
 0x3c7   :  { %v321_v61 = vadd.f32 1.0, %v1114_v60 }
 0x3c9   :  { %1115 = vrcp.f32 %v321_v61 }
 0x3d3   :  { %v1116_v62 = vpop.eup %1115 }
 0x3d4   :  { %v324_v63 = vmul.f32 2.0, %v1116_v62  ;;  %v326_v4 = vmul.f32 %v1116_v62, %v263_v45 }
 0x3d6   :  { %v941_v0 = vadd.f32 -1.0, %v324_v63 }
 0x3d8   :  { %328 = vrot.lane.b32.xlu0 %v941_v0, %s1158_s3 }
 0x44a   :  { %v329_v1 = vpop.permute.xlu0 %328 }
 0x44b   :  { %v331_v3 = vmul.f32 %v1116_v62, %v329_v1 }
 0x44d   :  { %333 = vrot.lane.b32.xlu1 %v331_v3, %s1159_s19 }
 0x4bf   :  { %v334_v5 = vpop.permute.xlu1 %333 }
 0x4c0   :  { %v336_v6 = vadd.f32 %v334_v5, %v326_v4 }
 0x4c2   :  { %1117 = vtanh.f32 %v336_v6 }
 0x4cc   :  { %v1118_v10 = vpop.eup %1117 }
 0x4cd   :  { %339 = vrot.lane.b32.xlu0 %v1118_v10, %s1158_s3  ;;  %v171_v10 = vsel %vm1224_vm4, %v161_v9, %v143_v7 }
 0x53f   :  { %v340_v11 = vpop.permute.xlu0 %339 }
 0x540   :  { %v342_v12 = vmul.f32 %v1116_v62, %v340_v11 }
 0x542   :  { %v343_v13 = vpack.c.bf16 %v342_v12, %v342_v12 }
 0x544   :  { %345 = vrot.lane.b32.xlu1 %v343_v13, %s1159_s19 }
 0x5b6   :  { %v346_v19 = vpop.permute.xlu1 %345 }
 0x5b7   :  { %1034 = vmatmul.mubr.msk.bf16.vlgmr.msra.gmra.mrb[8].mxu0 %vm200_vm6, %v346_v19 }
 0x5b8   :  { %1046 = vmatpush3.bf16.msra.mxu0 %v1239_v17  ;;  %1049 = vmatprep.mubr.msk.bf16.mxu0 %vm1156_vm1, %v1155_v2 }
 0x5b9   :  { %1047 = vmatprep.subr.bf16.mxu0 %v1155_v2 }
 0x5bc   :  { %1048 = vmatpush3.bf16.msra.mxu0 %v1242_v20 }
 0x5bd   :  { %1061 = vmatprep.subr.bf16.mxu0 %v1155_v2 }
 0x68a   :  { %v384_v27 = vpop.f32.mrb[8].mxu0 }
 0x68b   :  { %v390_v28 = vadd.f32 %v384_v27, %v169_v25  ;;  %v1035_v29 = vpop.f32.mrb[9].mxu0 }
 0x68c   :  { %v387_v30 = vpop.f32.mrb[10].mxu0 }
 0x68d   :  { %v943_v31 = vmul.f32 -1.442695, %v390_v28  ;;  %v1036_v32 = vpop.f32.mrb[11].mxu0 }
 0x68f   :  { %1119 = vpow2.f32 %v943_v31 }
 0x699   :  { %v1120_v33 = vpop.eup %1119 }
 0x69a   :  { %v394_v34 = vadd.f32 1.0, %v1120_v33 }
 0x69c   :  { %1121 = vrcp.f32 %v394_v34 }
 0x6a6   :  { %v1122_v35 = vpop.eup %1121 }
 0x6a7   :  { %v397_v36 = vmul.f32 2.0, %v1122_v35  ;;  %v399_v39 = vmul.f32 %v1122_v35, %v336_v6 }
 0x6a9   :  { %v944_v37 = vadd.f32 -1.0, %v397_v36 }
 0x6ab   :  { %401 = vrot.lane.b32.xlu0 %v944_v37, %s1158_s3 }
 0x71d   :  { %v402_v23 = vpop.permute.xlu0 %401 }
 0x71e   :  { %v404_v38 = vmul.f32 %v1122_v35, %v402_v23 }
 0x720   :  { %406 = vrot.lane.b32.xlu1 %v404_v38, %s1159_s19 }
 0x792   :  { %v407_v40 = vpop.permute.xlu1 %406 }
 0x793   :  { %v409_v41 = vadd.f32 %v407_v40, %v399_v39  ;;  %v146_v39 = vadd.f32 %v1260_v22, %v1303_v18 }
 0x795   :  { %1123 = vtanh.f32 %v409_v41  ;;  %v162_v40 = vmul.f32 2.0, %v146_v39 }
 0x79f   :  { %v1124_v42 = vpop.eup %1123 }
 0x7a0   :  { %412 = vrot.lane.b32.xlu0 %v1124_v42, %s1158_s3 }
 0x812   :  { %v413_v43 = vpop.permute.xlu0 %412 }
 0x813   :  { %v415_v44 = vmul.f32 %v1122_v35, %v413_v43 }
 0x815   :  { %v416_v45 = vpack.c.bf16 %v415_v44, %v415_v44 }
 0x817   :  { %418 = vrot.lane.b32.xlu1 %v416_v45, %s1159_s19 }
 0x889   :  { %v419_v46 = vpop.permute.xlu1 %418 }
 0x88a   :  { %1042 = vmatmul.mubr.msk.bf16.vlgmr.msra.gmra.mrb[8].mxu1 %vm200_vm6, %v419_v46 }
 0x88b   :  { %1054 = vmatpush3.bf16.msra.mxu1 %v1239_v17  ;;  %1057 = vmatprep.mubr.msk.bf16.mxu1 %vm1156_vm1, %v1155_v2 }
 0x88c   :  { %1055 = vmatprep.subr.bf16.mxu1 %v1155_v2 }
 0x88f   :  { %1056 = vmatpush3.bf16.msra.mxu1 %v1242_v20 }
 0x890   :  { %1069 = vmatprep.subr.bf16.mxu1 %v1155_v2 }
 0x95d   :  { %v457_v50 = vpop.f32.mrb[8].mxu1 }
 0x95e   :  { %v463_v51 = vadd.f32 %v457_v50, %v170_v49  ;;  %v1043_v52 = vpop.f32.mrb[9].mxu1 }
 0x95f   :  { %v460_v53 = vpop.f32.mrb[10].mxu1 }
 0x960   :  { %v946_v54 = vmul.f32 -1.442695, %v463_v51  ;;  %v1044_v55 = vpop.f32.mrb[11].mxu1 }
 0x962   :  { %1125 = vpow2.f32 %v946_v54 }
 0x96c   :  { %v1126_v56 = vpop.eup %1125 }
 0x96d   :  { %v467_v57 = vadd.f32 1.0, %v1126_v56 }
 0x96f   :  { %1127 = vrcp.f32 %v467_v57 }
 0x979   :  { %v1128_v58 = vpop.eup %1127 }
 0x97a   :  { %v470_v59 = vmul.f32 2.0, %v1128_v58  ;;  %v472_v62 = vmul.f32 %v1128_v58, %v409_v41  ;;  %v172_v41 = vsel %vm1224_vm4, %v162_v40, %v146_v39 }
 0x97c   :  { %v947_v60 = vadd.f32 -1.0, %v470_v59 }
 0x97e   :  { %474 = vrot.lane.b32.xlu0 %v947_v60, %s1158_s3  ;;  %v151_v60 = vadd.f32 %v1297_v14, %v1260_v22 }
 0x9f0   :  { %v475_v26 = vpop.permute.xlu0 %474 }
 0x9f1   :  { %v477_v61 = vmul.f32 %v1128_v58, %v475_v26  ;;  %v163_v26 = vmul.f32 2.0, %v151_v60 }
 0x9f3   :  { %479 = vrot.lane.b32.xlu1 %v477_v61, %s1159_s19  ;;  %v173_v61 = vsel %vm1224_vm4, %v163_v26, %v151_v60 }
 0xa65   :  { %v480_v63 = vpop.permute.xlu1 %479 }
 0xa66   :  { %v482_v0 = vadd.f32 %v480_v63, %v472_v62 }
 0xa68   :  { %1129 = vtanh.f32 %v482_v0 }
 0xa72   :  { %v1130_v1 = vpop.eup %1129 }
 0xa73   :  { %485 = vrot.lane.b32.xlu0 %v1130_v1, %s1158_s3 }
 0xae5   :  { %v486_v3 = vpop.permute.xlu0 %485 }
 0xae6   :  { %v488_v4 = vmul.f32 %v1128_v58, %v486_v3 }
 0xae8   :  { %v489_v5 = vpack.c.bf16 %v488_v4, %v488_v4 }
 0xaea   :  { %491 = vrot.lane.b32.xlu1 %v489_v5, %s1159_s19 }
 0xb5c   :  { %v492_v6 = vpop.permute.xlu1 %491 }
 0xb5d   :  { %1050 = vmatmul.mubr.msk.bf16.vlgmr.msra.gmra.mrb[12].mxu0 %vm200_vm6, %v492_v6 }
 0xb5e   :  { %1062 = vmatpush3.bf16.msra.mxu0 %v1239_v17  ;;  %1065 = vmatprep.mubr.msk.bf16.mxu0 %vm1156_vm1, %v1155_v2 }
 0xb5f   :  { %1063 = vmatprep.subr.bf16.mxu0 %v1155_v2 }
 0xb62   :  { %1064 = vmatpush3.bf16.msra.mxu0 %v1242_v20 }
 0xb63   :  { %1077 = vmatprep.subr.bf16.mxu0 %v1155_v2 }
 0xc30   :  { %v530_v11 = vpop.f32.mrb[12].mxu0 }
 0xc31   :  { %v536_v12 = vadd.f32 %v530_v11, %v171_v10  ;;  %v1051_v13 = vpop.f32.mrb[13].mxu0 }
 0xc32   :  { %v533_v19 = vpop.f32.mrb[14].mxu0 }
 0xc33   :  { %v949_v21 = vmul.f32 -1.442695, %v536_v12  ;;  %v1052_v24 = vpop.f32.mrb[15].mxu0 }
 0xc35   :  { %1131 = vpow2.f32 %v949_v21 }
 0xc3f   :  { %v1132_v25 = vpop.eup %1131 }
 0xc40   :  { %v540_v27 = vadd.f32 1.0, %v1132_v25 }
 0xc42   :  { %1133 = vrcp.f32 %v540_v27 }
 0xc4c   :  { %v1134_v28 = vpop.eup %1133 }
 0xc4d   :  { %v543_v29 = vmul.f32 2.0, %v1134_v28  ;;  %v545_v32 = vmul.f32 %v1134_v28, %v482_v0 }
 0xc4f   :  { %v950_v30 = vadd.f32 -1.0, %v543_v29  ;;  %v154_v29 = vadd.f32 %v1301_v16, %v1260_v22 }
 0xc51   :  { %547 = vrot.lane.b32.xlu0 %v950_v30, %s1158_s3  ;;  %v164_v30 = vmul.f32 2.0, %v154_v29 }
 0xcc3   :  { %v548_v15 = vpop.permute.xlu0 %547 }
 0xcc4   :  { %v550_v31 = vmul.f32 %v1134_v28, %v548_v15  ;;  %v174_v15 = vsel %vm1224_vm4, %v164_v30, %v154_v29 }
 0xcc6   :  { %552 = vrot.lane.b32.xlu1 %v550_v31, %s1159_s19 }
 0xd38   :  { %v553_v33 = vpop.permute.xlu1 %552 }
 0xd39   :  { %v555_v34 = vadd.f32 %v553_v33, %v545_v32 }
 0xd3b   :  { %1135 = vtanh.f32 %v555_v34 }
 0xd45   :  { %v1136_v35 = vpop.eup %1135 }
 0xd46   :  { %558 = vrot.lane.b32.xlu0 %v1136_v35, %s1158_s3 }
 0xdb8   :  { %v559_v36 = vpop.permute.xlu0 %558 }
 0xdb9   :  { %v561_v37 = vmul.f32 %v1134_v28, %v559_v36 }
 0xdbb   :  { %v562_v23 = vpack.c.bf16 %v561_v37, %v561_v37 }
 0xdbd   :  { %564 = vrot.lane.b32.xlu1 %v562_v23, %s1159_s19 }
 0xe2f   :  { %v565_v38 = vpop.permute.xlu1 %564 }
 0xe30   :  { %1058 = vmatmul.mubr.msk.bf16.vlgmr.msra.gmra.mrb[12].mxu1 %vm200_vm6, %v565_v38 }
 0xe31   :  { %1070 = vmatpush3.bf16.msra.mxu1 %v1239_v17  ;;  %1073 = vmatprep.mubr.msk.bf16.mxu1 %vm1156_vm1, %v1155_v2 }
 0xe32   :  { %1071 = vmatprep.subr.bf16.mxu1 %v1155_v2 }
 0xe35   :  { %1072 = vmatpush3.bf16.msra.mxu1 %v1242_v20 }
 0xe36   :  { %1085 = vmatprep.subr.bf16.mxu1 %v1155_v2 }
 0xf03   :  { %v603_v42 = vpop.f32.mrb[12].mxu1 }
 0xf04   :  { %v609_v43 = vadd.f32 %v603_v42, %v172_v41  ;;  %v1059_v44 = vpop.f32.mrb[13].mxu1 }
 0xf05   :  { %v606_v17 = vpop.f32.mrb[14].mxu1  ;;  %v1104_v44 = vld [vmem:[%s1416_s4 + $0x8] sm:$0xff]  }
 0xf06   :  { %v952_v45 = vmul.f32 -1.442695, %v609_v43  ;;  %v1060_v46 = vpop.f32.mrb[15].mxu1  ;;  %v1103_v43 = vld [vmem:[%s1416_s4] sm:$0xff]  }
 0xf08   :  { %1137 = vpow2.f32 %v952_v45  ;;  %v1105_v45 = vld [vmem:[%s1417_s6] sm:$0xff]  }
 0xf12   :  { %v1138_v47 = vpop.eup %1137 }
 0xf13   :  { %v613_v48 = vadd.f32 1.0, %v1138_v47 }
 0xf15   :  { %1139 = vrcp.f32 %v613_v48 }
 0xf1f   :  { %v1140_v20 = vpop.eup %1139 }
 0xf20   :  { %v616_v49 = vmul.f32 2.0, %v1140_v20  ;;  %v618_v52 = vmul.f32 %v1140_v20, %v555_v34 }
 0xf22   :  { %v953_v50 = vadd.f32 -1.0, %v616_v49  ;;  %v1106_v49 = vld [vmem:[%s1417_s6 + $0x8] sm:$0xff]  }
 0xf24   :  { %620 = vrot.lane.b32.xlu0 %v953_v50, %s1158_s3  ;;  %v960_v50 = vld [vmem:[%s1418_s5] ss:$0 sm:$0xff] }
 0xf96   :  { %v621_v18 = vpop.permute.xlu0 %620 }
 0xf97   :  { %v623_v51 = vmul.f32 %v1140_v20, %v621_v18 }
 0xf99   :  { %625 = vrot.lane.b32.xlu1 %v623_v51, %s1159_s19 }
0x100b   :  { %v626_v53 = vpop.permute.xlu1 %625 }
0x100c   :  { %v628_v54 = vadd.f32 %v626_v53, %v618_v52 }
0x100e   :  { %1141 = vtanh.f32 %v628_v54 }
0x1018   :  { %v1142_v55 = vpop.eup %1141 }
0x1019   :  { %631 = vrot.lane.b32.xlu0 %v1142_v55, %s1158_s3 }
0x108b   :  { %v632_v56 = vpop.permute.xlu0 %631 }
0x108c   :  { %v634_v57 = vmul.f32 %v1140_v20, %v632_v56  ;;  %v964_v56 = vld [vmem:[%s1419_s7] ss:$0 sm:$0xff] }
0x108e   :  { %v635_v58 = vpack.c.bf16 %v634_v57, %v634_v57 }
0x1090   :  { %637 = vrot.lane.b32.xlu1 %v635_v58, %s1159_s19 }
0x1102   :  { %v638_v59 = vpop.permute.xlu1 %637 }
0x1103   :  { %1066 = vmatmul.mubr.msk.bf16.vlgmr.msra.gmra.mrb[16].mxu0 %vm200_vm6, %v638_v59 }
0x1104   :  { %1081 = vmatprep.mubr.msk.bf16.mxu0 %vm1156_vm1, %v1155_v2  ;;  %1078 = vmatpush3.bf16.msra.mxu0 %v1103_v43 }
0x1105   :  { %1079 = vmatprep.subr.bf16.mxu0 %v1155_v2 }
0x1108   :  { %1080 = vmatpush3.bf16.msra.mxu0 %v1104_v44 }
0x11d6   :  { %v676_v62 = vpop.f32.mrb[16].mxu0 }
0x11d7   :  { %v682_v63 = vadd.f32 %v676_v62, %v173_v61  ;;  %v1067_v0 = vpop.f32.mrb[17].mxu0 }
0x11d8   :  { %v679_v1 = vpop.f32.mrb[18].mxu0 }
0x11d9   :  { %v955_v3 = vmul.f32 -1.442695, %v682_v63  ;;  %v1068_v4 = vpop.f32.mrb[19].mxu0 }
0x11db   :  { %1143 = vpow2.f32 %v955_v3 }
0x11e5   :  { %v1144_v5 = vpop.eup %1143 }
0x11e6   :  { %v686_v6 = vadd.f32 1.0, %v1144_v5 }
0x11e8   :  { %1145 = vrcp.f32 %v686_v6 }
0x11f2   :  { %v1146_v7 = vpop.eup %1145 }
0x11f3   :  { %v689_v9 = vmul.f32 2.0, %v1146_v7  ;;  %v691_v12 = vmul.f32 %v1146_v7, %v628_v54 }
0x11f5   :  { %v956_v10 = vadd.f32 -1.0, %v689_v9 }
0x11f7   :  { %693 = vrot.lane.b32.xlu0 %v956_v10, %s1158_s3 }
0x1269   :  { %v694_v14 = vpop.permute.xlu0 %693 }
0x126a   :  { %v696_v11 = vmul.f32 %v1146_v7, %v694_v14 }
0x126c   :  { %698 = vrot.lane.b32.xlu1 %v696_v11, %s1159_s19 }
0x12de   :  { %v699_v13 = vpop.permute.xlu1 %698 }
0x12df   :  { %v701_v19 = vadd.f32 %v699_v13, %v691_v12 }
0x12e1   :  { %1147 = vtanh.f32 %v701_v19 }
0x12eb   :  { %v1148_v21 = vpop.eup %1147 }
0x12ec   :  { %704 = vrot.lane.b32.xlu0 %v1148_v21, %s1158_s3 }
0x135e   :  { %v705_v24 = vpop.permute.xlu0 %704 }
0x135f   :  { %v707_v25 = vmul.f32 %v1146_v7, %v705_v24 }
0x1361   :  { %v708_v27 = vpack.c.bf16 %v707_v25, %v707_v25 }
0x1363   :  { %710 = vrot.lane.b32.xlu1 %v708_v27, %s1159_s19 }
0x13d5   :  { %v711_v28 = vpop.permute.xlu1 %710 }
0x13d6   :  { %1074 = vmatmul.mubr.msk.bf16.vlgmr.msra.gmra.mrb[16].mxu1 %vm200_vm6, %v711_v28 }
0x13d7   :  { %1089 = vmatprep.mubr.msk.bf16.mxu1 %vm1156_vm1, %v1155_v2  ;;  %1086 = vmatpush3.bf16.msra.mxu1 %v1105_v45 }
0x13d8   :  { %1087 = vmatprep.subr.bf16.mxu1 %v1155_v2 }
0x13db   :  { %1088 = vmatpush3.bf16.msra.mxu1 %v1106_v49 }
0x14a9   :  { %v749_v31 = vpop.f32.mrb[16].mxu1 }
0x14aa   :  { %v755_v32 = vadd.f32 %v749_v31, %v174_v15  ;;  %v1075_v33 = vpop.f32.mrb[17].mxu1 }
0x14ab   :  { %v752_v34 = vpop.f32.mrb[18].mxu1 }
0x14ac   :  { %v958_v35 = vmul.f32 -1.442695, %v755_v32  ;;  %v1076_v36 = vpop.f32.mrb[19].mxu1 }
0x14ae   :  { %1149 = vpow2.f32 %v958_v35 }
0x14b8   :  { %v1150_v37 = vpop.eup %1149 }
0x14b9   :  { %v759_v23 = vadd.f32 1.0, %v1150_v37 }
0x14bb   :  { %1151 = vrcp.f32 %v759_v23 }
0x14c5   :  { %v1152_v38 = vpop.eup %1151 }
0x14c6   :  { %v762_v39 = vmul.f32 2.0, %v1152_v38  ;;  %v764_v8 = vmul.f32 %v1152_v38, %v701_v19 }
0x14c8   :  { %v959_v40 = vadd.f32 -1.0, %v762_v39 }
0x14ca   :  { %766 = vrot.lane.b32.xlu0 %v959_v40, %s1158_s3 }
0x153c   :  { %v767_v22 = vpop.permute.xlu0 %766 }
0x153d   :  { %v769_v16 = vmul.f32 %v1152_v38, %v767_v22 }
0x153f   :  { %771 = vrot.lane.b32.xlu1 %v769_v16, %s1159_s19 }
0x15b1   :  { %v772_v41 = vpop.permute.xlu1 %771 }
0x15b2   :  { %v774_v42 = vadd.f32 %v772_v41, %v764_v8 }
0x15b4   :  { %1153 = vtanh.f32 %v774_v42 }
0x15be   :  { %v1154_v17 = vpop.eup %1153 }
0x15bf   :  { %777 = vrot.lane.b32.xlu0 %v1154_v17, %s1158_s3 }
0x1631   :  { %v778_v46 = vpop.permute.xlu0 %777 }
0x1632   :  { %v780_v47 = vmul.f32 %v1152_v38, %v778_v46 }
0x1634   :  { %v781_v48 = vpack.c.bf16 %v780_v47, %v780_v47 }
0x1636   :  { %794 = vrot.lane.b32.xlu1 %v781_v48, %s1159_s19 }
0x16a8   :  { %v795_v20 = vpop.permute.xlu1 %794 }
0x16a9   :  { %1082 = vmatmul.mubr.msk.bf16.vlgmr.msra.gmra.mrb[20].mxu0 %vm200_vm6, %v795_v20 }
0x177c   :  { %v845_v18 = vpop.f32.mrb[20].mxu0 }
0x177d   :  { %v846_v51 = vadd.f32 %v960_v50, %v845_v18  ;;  %v1083_v2 = vpop.f32.mrb[21].mxu0 }
0x177e   :  { %v848_v52 = vpop.f32.mrb[22].mxu0 }
0x177f   :  { %v851_v53 = vmax.f32 %v846_v51, 0.0  ;;  %v1084_v54 = vpop.f32.mrb[23].mxu0 }
0x1781   :  { %v852_v55 = vpack.c.bf16 %v851_v53, %v851_v53 }
0x1783   :  { %1090 = vmatmul.mubr.msk.bf16.vlgmr.msra.gmra.mrb[20].mxu1 %vm200_vm6, %v852_v55 }
0x1856   :  { %v913_v57 = vpop.f32.mrb[20].mxu1 }
0x1857   :  { %v914_v58 = vadd.f32 %v964_v56, %v913_v57  ;;  %v1091_v59 = vpop.f32.mrb[21].mxu1 }
0x1858   :  { %v916_v60 = vpop.f32.mrb[22].mxu1 }
0x1859   :  { %920 = vst.msk [vmem:[%s1420_s8] sm:$0xff] %vm919_vm7, %v914_v58  ;;  %v1092_v26 = vpop.f32.mrb[23].mxu1 }

</bundles_post_ra>
